<compile_context>
chip_gen: v7x
topology: tpu7x:2x2x1
jax: 0.10.0
libtpu: 0.0.40
codegen_flags: <defaults>
</compile_context>

<pallas_src>
import math
import numpy as np
import jax
import jax.numpy as jnp
from jax.experimental import pallas as pl
from jax.experimental.pallas import tpu as pltpu


def make_drqn_kernel(H, Gw, W):
    """H: hidden dim, Gw: gate lane-group width (mult. of 128), W: head width."""
    H2 = 2 * H

    def kernel(x_seq_ref, hw0_ref, w_in_ref, b_in_ref, w_g_ref, b_g_ref,
               w_head_ref, b_head_ref, q_ref):
        T, Bp, _ = x_seq_ref.shape

        # Weights loaded once; bias broadcasts hoisted out of the time loop.
        w_in = w_in_ref[...]
        w_g = w_g_ref[...]
        w_head = w_head_ref[...]
        b_in = jnp.broadcast_to(b_in_ref[...], (Bp, H2))
        b_g = jnp.broadcast_to(b_g_ref[...], (Bp, 4 * Gw))
        b_head = jnp.broadcast_to(b_head_ref[...], (Bp, W))

        def step(t, hw):
            # hw: (Bp, 2H) wide carry -- zeros at lanes 0:H, h at lanes H:2H.
            x = x_seq_ref[t]                                     # (Bp, D_in)

            # input layer + ReLU; output already in wide layout (a | zeros)
            a = jnp.maximum(
                jnp.dot(x, w_in, preferred_element_type=jnp.float32) + b_in,
                0.0)
            xh = a + hw                                          # [a | h], one VPU add

            # single fused, gate-aligned GRU matmul -> [r_pre | z_pre | i_n | h_n]
            g = jnp.dot(xh, w_g, preferred_element_type=jnp.float32) + b_g
            r = jax.nn.sigmoid(g[:, 0 * Gw:0 * Gw + H2])
            z = jax.nn.sigmoid(g[:, 1 * Gw:1 * Gw + H2])
            n = jnp.tanh(g[:, 2 * Gw:2 * Gw + H2]
                         + r * g[:, 3 * Gw:3 * Gw + H2])
            hw_new = (1.0 - z) * n + z * hw                      # pad lanes stay 0

            # fused heads + identity(h): one lane-dense 128-multiple wide store
            q_ref[t] = (jnp.dot(hw_new, w_head,
                                preferred_element_type=jnp.float32) + b_head)
            return hw_new

        unroll = True if T <= 16 else 8
        _ = jax.lax.fori_loop(0, T, step, hw0_ref[...], unroll=unroll)

    return kernel


def pack_params(params):
    """Host-side packing: wide input layer, fused gate-aligned GRU weights,
    and a fused head slab [pilot | power | 0-pad | identity(h)]."""
    H = params["w_hh"].shape[0]
    D_in = params["w_in"].shape[0]
    P = params["w_pilot"].shape[1]
    H2 = 2 * H
    Gw = 128 * int(math.ceil(H2 / 128))            # gate lane-group width
    W = 128 * int(math.ceil((P + 1 + H) / 128))    # fused head slab width

    w_ih = np.asarray(params["w_ih"], np.float32)  # (H, 3H), cols [r|z|n]
    w_hh = np.asarray(params["w_hh"], np.float32)
    b_ih = np.asarray(params["b_ih"], np.float32)  # (1, 3H)
    b_hh = np.asarray(params["b_hh"], np.float32)

    # input layer -> wide layout: `a` occupies lanes 0:H, lanes H:2H stay zero
    w_in = np.zeros((D_in, H2), np.float32)
    w_in[:, 0:H] = np.asarray(params["w_in"], np.float32)
    b_in = np.zeros((1, H2), np.float32)
    b_in[:, 0:H] = np.asarray(params["b_in"], np.float32)

    # fused gate weights: xh = [a | h] (2H wide) -> 4 groups of Gw lanes;
    # each gate's H valid columns sit at lanes H:2H of its group (matching the
    # wide carry layout); r/z input+hidden contributions are pre-summed.
    w_g = np.zeros((H2, 4 * Gw), np.float32)
    b_g = np.zeros((1, 4 * Gw), np.float32)
    col = lambda grp: slice(grp * Gw + H, grp * Gw + H2)
    # r gate (summed input + hidden contribution)
    w_g[0:H, col(0)] = w_ih[:, 0:H]
    w_g[H:H2, col(0)] = w_hh[:, 0:H]
    b_g[:, col(0)] = b_ih[:, 0:H] + b_hh[:, 0:H]
    # z gate (summed input + hidden contribution)
    w_g[0:H, col(1)] = w_ih[:, H:2 * H]
    w_g[H:H2, col(1)] = w_hh[:, H:2 * H]
    b_g[:, col(1)] = b_ih[:, H:2 * H] + b_hh[:, H:2 * H]
    # n gate, input contribution
    w_g[0:H, col(2)] = w_ih[:, 2 * H:3 * H]
    b_g[:, col(2)] = b_ih[:, 2 * H:3 * H]
    # n gate, hidden contribution (kept separate: multiplied by r)
    w_g[H:H2, col(3)] = w_hh[:, 2 * H:3 * H]
    b_g[:, col(3)] = b_hh[:, 2 * H:3 * H]

    # fused head slab: columns [pilot | power | zero pad | identity(h)]
    w_head = np.zeros((H2, W), np.float32)
    b_head = np.zeros((1, W), np.float32)
    w_head[H:H2, 0:P] = np.asarray(params["w_pilot"], np.float32)
    w_head[H:H2, P:P + 1] = np.asarray(params["w_power"], np.float32)
    w_head[H:H2, W - H:W] = np.eye(H, dtype=np.float32)
    b_head[:, 0:P] = np.asarray(params["b_pilot"], np.float32)
    b_head[:, P:P + 1] = np.asarray(params["b_power"], np.float32)

    return {
        "w_in": jnp.asarray(w_in), "b_in": jnp.asarray(b_in),
        "w_g": jnp.asarray(w_g), "b_g": jnp.asarray(b_g),
        "w_head": jnp.asarray(w_head), "b_head": jnp.asarray(b_head),
        "hidden_dim": H, "input_dim": D_in, "pilot_out": P,
        "gate_width": Gw, "head_width": W,
    }


def drqn_apply_sequence(x_seq, h0, pp):
    """Run the whole T-step GRU recurrence inside (one or a few) pallas_call(s).

    x_seq: (T, B, D_in) f32, h0: (B, H) f32.
    Returns ((q_pilot_seq (T,B,P), q_power_seq (T,B,1)), h_seq (T,B,H)).
    """
    T, B, D_in = x_seq.shape
    H = pp["hidden_dim"]
    P = pp["pilot_out"]
    Gw = pp["gate_width"]
    W = pp["head_width"]
    H2 = 2 * H
    assert D_in == pp["input_dim"] and h0.shape == (B, H)

    # Pad batch to a full f32 sublane count (>=8, multiple of 8).
    Bp = max(8, ((B + 7) // 8) * 8)
    if Bp != B:
        x_seq = jnp.pad(x_seq, ((0, 0), (0, Bp - B), (0, 0)))
    # Carry enters in the wide layout: zeros at lanes 0:H, h at lanes H:2H.
    hw = jnp.pad(h0, ((0, Bp - B), (H, 0)))

    kernel = make_drqn_kernel(H, Gw, W)
    idx2 = lambda i: (0, 0)
    idx3 = lambda i: (0, 0, 0)

    T_CHUNK = 256   # keep per-call x/output slabs comfortably inside VMEM
    slabs = []
    for s in range(0, T, T_CHUNK):
        Tc = min(T_CHUNK, T - s)
        x_c = jax.lax.slice_in_dim(x_seq, s, s + Tc, axis=0)
        slab = pl.pallas_call(
            kernel,
            out_shape=jax.ShapeDtypeStruct((Tc, Bp, W), jnp.float32),
            grid=(1,),
            in_specs=[
                pl.BlockSpec((Tc, Bp, D_in), idx3),   # x chunk
                pl.BlockSpec((Bp, H2), idx2),         # wide hidden carry
                pl.BlockSpec((D_in, H2), idx2),       # w_in (wide)
                pl.BlockSpec((1, H2), idx2),          # b_in (wide)
                pl.BlockSpec((H2, 4 * Gw), idx2),     # fused gate weights
                pl.BlockSpec((1, 4 * Gw), idx2),      # fused gate bias
                pl.BlockSpec((H2, W), idx2),          # fused head (+identity)
                pl.BlockSpec((1, W), idx2),           # fused head bias
            ],
            out_specs=pl.BlockSpec((Tc, Bp, W), idx3),
            compiler_params=pltpu.CompilerParams(
                dimension_semantics=("arbitrary",)),
        )(x_c, hw, pp["w_in"], pp["b_in"], pp["w_g"], pp["b_g"],
          pp["w_head"], pp["b_head"])
        slabs.append(slab)
        if s + Tc < T:
            # exact carry to next chunk: identity block of the slab is h itself
            hw = jnp.pad(slab[-1, :, W - H:W], ((0, 0), (H, 0)))

    q_slab = slabs[0] if len(slabs) == 1 else jnp.concatenate(slabs, axis=0)
    q_pilot_seq = q_slab[:, :B, 0:P]
    q_power_seq = q_slab[:, :B, P:P + 1]
    h_seq = q_slab[:, :B, W - H:W]
    return (q_pilot_seq, q_power_seq), h_seq


def drqn_forward(inputs, hidden_state, packed_params):
    """Single-step forward matching the PyTorch module (learn_power=True)."""
    H = packed_params["hidden_dim"]
    h_in = hidden_state.reshape(-1, H)
    (qp_seq, qw_seq), h_seq = drqn_apply_sequence(inputs[None], h_in,
                                                  packed_params)
    return (qp_seq[0], qw_seq[0]), h_seq[0]


def init_params(key, d_in, hidden, pilot_out):
    """Deterministic PyTorch-style uniform init; linear weights stored as (in, out)."""
    ks = jax.random.split(key, 12)

    def uni(k, shape, fan_in):
        bound = 1.0 / math.sqrt(fan_in)
        return jax.random.uniform(k, shape, jnp.float32, -bound, bound)

    return {
        # input_layer: Linear(d_in, hidden) -> stored transposed (d_in, hidden)
        "w_in": uni(ks[0], (d_in, hidden), d_in),
        "b_in": uni(ks[1], (1, hidden), d_in),
        # GRUCell(hidden, hidden): weight_ih/_hh (3H, H) -> stored transposed
        "w_ih": uni(ks[2], (hidden, 3 * hidden), hidden),
        "b_ih": uni(ks[3], (1, 3 * hidden), hidden),
        "w_hh": uni(ks[4], (hidden, 3 * hidden), hidden),
        "b_hh": uni(ks[5], (1, 3 * hidden), hidden),
        # pilot_layer: Linear(hidden, pilot_out)
        "w_pilot": uni(ks[6], (hidden, pilot_out), hidden),
        "b_pilot": uni(ks[7], (1, pilot_out), hidden),
        # power_layer: Linear(hidden, 1)   (args.learn_power = True)
        "w_power": uni(ks[8], (hidden, 1), hidden),
        "b_power": uni(ks[9], (1, 1), hidden),
    }


def drqn_reference(inputs, hidden_state, params):
    """Pure-JAX reference mirroring the PyTorch forward (single step)."""
    H = params["w_hh"].shape[0]
    h_in = hidden_state.reshape(-1, H)
    a = jnp.maximum(inputs @ params["w_in"] + params["b_in"], 0.0)
    gi = a @ params["w_ih"] + params["b_ih"]
    gh = h_in @ params["w_hh"] + params["b_hh"]
    i_r, i_z, i_n = gi[:, :H], gi[:, H:2 * H], gi[:, 2 * H:]
    h_r, h_z, h_n = gh[:, :H], gh[:, H:2 * H], gh[:, 2 * H:]
    r = jax.nn.sigmoid(i_r + h_r)
    z = jax.nn.sigmoid(i_z + h_z)
    n = jnp.tanh(i_n + r * h_n)
    h = (1.0 - z) * n + z * h_in
    q_pilot = h @ params["w_pilot"] + params["b_pilot"]
    q_power = h @ params["w_power"] + params["b_power"]
    return (q_pilot, q_power), h


def drqn_reference_sequence(x_seq, h0, params):
    def step(h, x):
        (qp, qw), h2 = drqn_reference(x, h, params)
        return h2, (qp, qw, h2)
    _, (qp, qw, hs) = jax.lax.scan(step, h0, x_seq)
    return (qp, qw), hs


if __name__ == "__main__":
    # shapes implied by the module:
    #   drqn_input_dim=16, drqn_hidden_dim=32, drqn_pilot_output_dim=8, learn_power=True
    B, D_IN, HIDDEN, PILOT_OUT, T = 2, 16, 32, 8, 6

    key = jax.random.PRNGKey(0)
    k_params, k_x, k_h, k_seq = jax.random.split(key, 4)

    params = init_params(k_params, D_IN, HIDDEN, PILOT_OUT)
    packed = pack_params(params)

    inputs = jax.random.normal(k_x, (B, D_IN), jnp.float32)
    hidden_state = jax.random.normal(k_h, (B, HIDDEN), jnp.float32)

    # --- single-step forward (exact module semantics) ---
    (q_pilot, q_power), h = drqn_forward(inputs, hidden_state, packed)
    jax.block_until_ready((q_pilot, q_power, h))

    (qp_ref, qw_ref), h_ref = drqn_reference(inputs, hidden_state, params)
    assert q_pilot.shape == (B, PILOT_OUT)
    assert q_power.shape == (B, 1)
    assert h.shape == (B, HIDDEN)
    np.testing.assert_allclose(np.asarray(q_pilot), np.asarray(qp_ref),
                               rtol=1e-5, atol=1e-5)
    np.testing.assert_allclose(np.asarray(q_power), np.asarray(qw_ref),
                               rtol=1e-5, atol=1e-5)
    np.testing.assert_allclose(np.asarray(h), np.asarray(h_ref),
                               rtol=1e-5, atol=1e-5)

    # --- fused multi-step recurrence (whole time loop inside one kernel) ---
    x_seq = jax.random.normal(k_seq, (T, B, D_IN), jnp.float32)
    (qp_seq, qw_seq), h_seq = drqn_apply_sequence(x_seq, hidden_state, packed)
    jax.block_until_ready((qp_seq, qw_seq, h_seq))

    (qp_seq_ref, qw_seq_ref), h_seq_ref = drqn_reference_sequence(
        x_seq, hidden_state, params)
    np.testing.assert_allclose(np.asarray(qp_seq), np.asarray(qp_seq_ref),
                               rtol=1e-4, atol=1e-4)
    np.testing.assert_allclose(np.asarray(qw_seq), np.asarray(qw_seq_ref),
                               rtol=1e-4, atol=1e-4)
    np.testing.assert_allclose(np.asarray(h_seq), np.asarray(h_seq_ref),
                               rtol=1e-4, atol=1e-4)

    print("KERNEL_OK")
</pallas_src>

<mosaic_0001>
module attributes {stable_mosaic.version = 11 : i64} {
  func.func @kernel(%arg0: i32, %arg1: memref<1x8x16xf32, #tpu.memory_space<vmem>>, %arg2: memref<8x64xf32, #tpu.memory_space<vmem>>, %arg3: memref<16x64xf32, #tpu.memory_space<vmem>>, %arg4: memref<1x64xf32, #tpu.memory_space<vmem>>, %arg5: memref<64x512xf32, #tpu.memory_space<vmem>>, %arg6: memref<1x512xf32, #tpu.memory_space<vmem>>, %arg7: memref<64x128xf32, #tpu.memory_space<vmem>>, %arg8: memref<1x128xf32, #tpu.memory_space<vmem>>, %arg9: memref<1x8x128xf32, #tpu.memory_space<vmem>>) attributes {dimension_semantics = [#tpu.dimension_semantics<arbitrary>], iteration_bounds = array<i64: 1>, scalar_prefetch = 0 : i64, scratch_operands = 0 : i64, tpu.core_type = #tpu.core_type<tc>, window_params = [{pipeline_mode = #tpu.pipeline_mode<synchronous>, transform_indices = @transform_0, window_bounds = array<i64: 1, 8, 16>}, {pipeline_mode = #tpu.pipeline_mode<synchronous>, transform_indices = @transform_1, window_bounds = array<i64: 8, 64>}, {pipeline_mode = #tpu.pipeline_mode<synchronous>, transform_indices = @transform_2, window_bounds = array<i64: 16, 64>}, {pipeline_mode = #tpu.pipeline_mode<synchronous>, transform_indices = @transform_3, window_bounds = array<i64: 1, 64>}, {pipeline_mode = #tpu.pipeline_mode<synchronous>, transform_indices = @transform_4, window_bounds = array<i64: 64, 512>}, {pipeline_mode = #tpu.pipeline_mode<synchronous>, transform_indices = @transform_5, window_bounds = array<i64: 1, 512>}, {pipeline_mode = #tpu.pipeline_mode<synchronous>, transform_indices = @transform_6, window_bounds = array<i64: 64, 128>}, {pipeline_mode = #tpu.pipeline_mode<synchronous>, transform_indices = @transform_7, window_bounds = array<i64: 1, 128>}, {pipeline_mode = #tpu.pipeline_mode<synchronous>, transform_indices = @transform_8, window_bounds = array<i64: 1, 8, 128>}]} {
    %c0 = arith.constant 0 : index
    %c0_0 = arith.constant 0 : index
    %0 = vector.load %arg3[%c0, %c0_0] : memref<16x64xf32, #tpu.memory_space<vmem>>, vector<16x64xf32>
    %c0_1 = arith.constant 0 : index
    %c0_2 = arith.constant 0 : index
    %1 = vector.load %arg5[%c0_1, %c0_2] : memref<64x512xf32, #tpu.memory_space<vmem>>, vector<64x512xf32>
    %c0_3 = arith.constant 0 : index
    %c0_4 = arith.constant 0 : index
    %2 = vector.load %arg7[%c0_3, %c0_4] : memref<64x128xf32, #tpu.memory_space<vmem>>, vector<64x128xf32>
    %c0_5 = arith.constant 0 : index
    %c0_6 = arith.constant 0 : index
    %3 = vector.load %arg4[%c0_5, %c0_6] : memref<1x64xf32, #tpu.memory_space<vmem>>, vector<1x64xf32>
    %4 = vector.shape_cast %3 : vector<1x64xf32> to vector<1x64xf32>
    %5 = vector.broadcast %4 : vector<1x64xf32> to vector<8x64xf32>
    %c0_7 = arith.constant 0 : index
    %c0_8 = arith.constant 0 : index
    %6 = vector.load %arg6[%c0_7, %c0_8] : memref<1x512xf32, #tpu.memory_space<vmem>>, vector<1x512xf32>
    %7 = vector.shape_cast %6 : vector<1x512xf32> to vector<1x512xf32>
    %8 = vector.broadcast %7 : vector<1x512xf32> to vector<8x512xf32>
    %c0_9 = arith.constant 0 : index
    %c0_10 = arith.constant 0 : index
    %9 = vector.load %arg8[%c0_9, %c0_10] : memref<1x128xf32, #tpu.memory_space<vmem>>, vector<1x128xf32>
    %10 = vector.shape_cast %9 : vector<1x128xf32> to vector<1x128xf32>
    %11 = vector.broadcast %10 : vector<1x128xf32> to vector<8x128xf32>
    %c0_11 = arith.constant 0 : index
    %c0_12 = arith.constant 0 : index
    %12 = vector.load %arg2[%c0_11, %c0_12] : memref<8x64xf32, #tpu.memory_space<vmem>>, vector<8x64xf32>
    %c0_i32 = arith.constant 0 : i32
    %13 = arith.index_cast %c0_i32 : i32 to index
    %c0_13 = arith.constant 0 : index
    %c0_14 = arith.constant 0 : index
    %14 = vector.load %arg1[%13, %c0_13, %c0_14] : memref<1x8x16xf32, #tpu.memory_space<vmem>>, vector<1x8x16xf32>
    %15 = vector.shape_cast %14 : vector<1x8x16xf32> to vector<8x16xf32>
    %cst = arith.constant dense<0.000000e+00> : vector<8x64xf32>
    %16 = tpu.matmul %15, %0, %cst {dimension_numbers = #tpu.dot_dimension_numbers<[1], [0], [0], [1], [0, 0, 1, 1], [], []>} : vector<8x16xf32>, vector<16x64xf32>, vector<8x64xf32> -> vector<8x64xf32>
    %17 = arith.addf %16, %5 : vector<8x64xf32>
    %cst_15 = arith.constant 0.000000e+00 : f32
    %18 = vector.broadcast %cst_15 : f32 to vector<8x64xf32>
    %19 = arith.maximumf %17, %18 : vector<8x64xf32>
    %20 = arith.addf %19, %12 : vector<8x64xf32>
    %cst_16 = arith.constant dense<0.000000e+00> : vector<8x512xf32>
    %21 = tpu.matmul %20, %1, %cst_16 {dimension_numbers = #tpu.dot_dimension_numbers<[1], [0], [0], [1], [0, 0, 1, 1], [], []>} : vector<8x64xf32>, vector<64x512xf32>, vector<8x512xf32> -> vector<8x512xf32>
    %22 = arith.addf %21, %8 : vector<8x512xf32>
    %23 = vector.extract_strided_slice %22 {offsets = [0, 0], sizes = [8, 64], strides = [1, 1]} : vector<8x512xf32> to vector<8x64xf32>
    %24 = arith.negf %23 : vector<8x64xf32>
    %25 = math.exp %24 : vector<8x64xf32>
    %cst_17 = arith.constant 1.000000e+00 : f32
    %26 = vector.broadcast %cst_17 : f32 to vector<8x64xf32>
    %27 = arith.addf %26, %25 : vector<8x64xf32>
    %28 = arith.divf %26, %27 : vector<8x64xf32>
    %29 = vector.extract_strided_slice %22 {offsets = [0, 128], sizes = [8, 64], strides = [1, 1]} : vector<8x512xf32> to vector<8x64xf32>
    %30 = arith.negf %29 : vector<8x64xf32>
    %31 = math.exp %30 : vector<8x64xf32>
    %cst_18 = arith.constant 1.000000e+00 : f32
    %32 = vector.broadcast %cst_18 : f32 to vector<8x64xf32>
    %33 = arith.addf %32, %31 : vector<8x64xf32>
    %34 = arith.divf %32, %33 : vector<8x64xf32>
    %35 = vector.extract_strided_slice %22 {offsets = [0, 256], sizes = [8, 64], strides = [1, 1]} : vector<8x512xf32> to vector<8x64xf32>
    %36 = vector.extract_strided_slice %22 {offsets = [0, 384], sizes = [8, 64], strides = [1, 1]} : vector<8x512xf32> to vector<8x64xf32>
    %37 = arith.mulf %28, %36 : vector<8x64xf32>
    %38 = arith.addf %35, %37 : vector<8x64xf32>
    %39 = math.tanh %38 : vector<8x64xf32>
    %cst_19 = arith.constant 1.000000e+00 : f32
    %40 = vector.broadcast %cst_19 : f32 to vector<8x64xf32>
    %41 = arith.subf %40, %34 : vector<8x64xf32>
    %42 = arith.mulf %41, %39 : vector<8x64xf32>
    %43 = arith.mulf %34, %12 : vector<8x64xf32>
    %44 = arith.addf %42, %43 : vector<8x64xf32>
    %cst_20 = arith.constant dense<0.000000e+00> : vector<8x128xf32>
    %45 = tpu.matmul %44, %2, %cst_20 {dimension_numbers = #tpu.dot_dimension_numbers<[1], [0], [0], [1], [0, 0, 1, 1], [], []>} : vector<8x64xf32>, vector<64x128xf32>, vector<8x128xf32> -> vector<8x128xf32>
    %46 = arith.addf %45, %11 : vector<8x128xf32>
    %47 = arith.index_cast %c0_i32 : i32 to index
    %c0_21 = arith.constant 0 : index
    %c0_22 = arith.constant 0 : index
    %48 = vector.load %arg9[%47, %c0_21, %c0_22] : memref<1x8x128xf32, #tpu.memory_space<vmem>>, vector<1x8x128xf32>
    %49 = vector.shape_cast %48 : vector<1x8x128xf32> to vector<8x128xf32>
    %50 = vector.shape_cast %46 : vector<8x128xf32> to vector<1x8x128xf32>
    tpu.vector_store %arg9[%47, %c0_21, %c0_22], %50 {strides = array<i32>} : memref<1x8x128xf32, #tpu.memory_space<vmem>>, vector<1x8x128xf32>,
    %c1_i32 = arith.constant 1 : i32
    return
  }
  func.func @transform_0(%arg0: i32) -> (i32, i32, i32) {
    %c0_i32 = arith.constant 0 : i32
    %c0_i32_0 = arith.constant 0 : i32
    %c0_i32_1 = arith.constant 0 : i32
    %c0_i32_2 = arith.constant 0 : i32
    return %c0_i32, %c0_i32_0, %c0_i32_1 : i32, i32, i32
  }
  func.func @transform_1(%arg0: i32) -> (i32, i32) {
    %c0_i32 = arith.constant 0 : i32
    %c0_i32_0 = arith.constant 0 : i32
    %c0_i32_1 = arith.constant 0 : i32
    return %c0_i32, %c0_i32_0 : i32, i32
  }
  func.func @transform_2(%arg0: i32) -> (i32, i32) {
    %c0_i32 = arith.constant 0 : i32
    %c0_i32_0 = arith.constant 0 : i32
    %c0_i32_1 = arith.constant 0 : i32
    return %c0_i32, %c0_i32_0 : i32, i32
  }
  func.func @transform_3(%arg0: i32) -> (i32, i32) {
    %c0_i32 = arith.constant 0 : i32
    %c0_i32_0 = arith.constant 0 : i32
    %c0_i32_1 = arith.constant 0 : i32
    return %c0_i32, %c0_i32_0 : i32, i32
  }
  func.func @transform_4(%arg0: i32) -> (i32, i32) {
    %c0_i32 = arith.constant 0 : i32
    %c0_i32_0 = arith.constant 0 : i32
    %c0_i32_1 = arith.constant 0 : i32
    return %c0_i32, %c0_i32_0 : i32, i32
  }
  func.func @transform_5(%arg0: i32) -> (i32, i32) {
    %c0_i32 = arith.constant 0 : i32
    %c0_i32_0 = arith.constant 0 : i32
    %c0_i32_1 = arith.constant 0 : i32
    return %c0_i32, %c0_i32_0 : i32, i32
  }
  func.func @transform_6(%arg0: i32) -> (i32, i32) {
    %c0_i32 = arith.constant 0 : i32
    %c0_i32_0 = arith.constant 0 : i32
    %c0_i32_1 = arith.constant 0 : i32
    return %c0_i32, %c0_i32_0 : i32, i32
  }
  func.func @transform_7(%arg0: i32) -> (i32, i32) {
    %c0_i32 = arith.constant 0 : i32
    %c0_i32_0 = arith.constant 0 : i32
    %c0_i32_1 = arith.constant 0 : i32
    return %c0_i32, %c0_i32_0 : i32, i32
  }
  func.func @transform_8(%arg0: i32) -> (i32, i32, i32) {
    %c0_i32 = arith.constant 0 : i32
    %c0_i32_0 = arith.constant 0 : i32
    %c0_i32_1 = arith.constant 0 : i32
    %c0_i32_2 = arith.constant 0 : i32
    return %c0_i32, %c0_i32_0, %c0_i32_1 : i32, i32, i32
  }
}

</mosaic_0001>

<bundles_post_ra>
// kernel: tpu_custom_call.1
= control target key start
LH: loop header
LB: loop body
LE: loop exit
PB: predicated region body
PF: predicated region fallthrough
CT: control target
= control target key end

     0   :  { %13 = vsyncpa [#allocation3], 0  ;;  %s934_s0 = inlined_call_operand.hbm [shape: f32[1,8,16], index: 0, kind: input, shape index: {}]   ;;  %s935_s1 = inlined_call_operand.hbm [shape: f32[8,64], index: 1, kind: input, shape index: {}]   ;;  %s936_s2 = inlined_call_operand.hbm [shape: f32[16,64], index: 2, kind: input, shape index: {}]   ;;  %s937_s3 = inlined_call_operand.vmem [shape: f32[1,64], index: 3, kind: input, shape index: {}]   ;;  %s938_s4 = inlined_call_operand.hbm [shape: f32[64,512], index: 4, kind: input, shape index: {}]   ;;  %s939_s5 = inlined_call_operand.vmem [shape: f32[1,512], index: 5, kind: input, shape index: {}]   ;;  %s940_s6 = inlined_call_operand.hbm [shape: f32[64,128], index: 6, kind: input, shape index: {}]   ;;  %s941_s7 = inlined_call_operand.vmem [shape: f32[1,128], index: 7, kind: input, shape index: {}]   ;;  %s942_s8 = inlined_call_operand.hbm [shape: f32[1,8,128], index: 8, kind: output, shape index: {}]  }
   0x1   :  { %14 = vsyncpa [#allocation6], 0 }
   0x2   :  { %15 = vsyncpa [#allocation9], 0 }
   0x3   :  { %16 = vsyncpa [#allocation4], 0  ;;  %s762_s27 = smov [#allocation5]   ;;  %s763_s29 = smov [#allocation8]  }
   0x4   :  { %s33_s28 = sshll.u32 %s762_s27, 4  ;;  %s56_s30 = sshll.u32 %s763_s29, 4  ;;  %s34_s28 = int_to_ptr.vmem [resolvable:$true] %s33_s28  ;;  %s820_s30 = int_to_ptr.vmem [resolvable:$true] %s56_s30 }
   0x5   :  { %s622_s11 = scalar_lea.hbm %s935_s1, 128 }
   0x6   :  { %p623_p0 = scmp.ne.s32.totalorder %s935_s1, %s622_s11  ;;  %p626_p1 = scmp.lt.u32.totalorder %s622_s11, %s935_s1 }
   0x8   :  { %p628_p2 = pnand %p626_p1, %p623_p0 }
   0xa   :  { %631 = shalt.err (!%p628_p2)
}
   0xb   :  { %s632_s16 = scalar_lea.vmem %s34_s28, 128  ;;  %p637_p4 = scmp.lt.s32.totalorder %s34_s28, %s34_s28 }
   0xc   :  { %p633_p3 = scmp.ne.s32.totalorder %s34_s28, %s632_s16  ;;  %p638_p5 = scmp.lt.s32.totalorder %s632_s16, %s632_s16 }
   0xe   :  { %p639_p6 = por %p638_p5, %p637_p4 }
  0x10   :  { %p640_p7 = pnand %p639_p6, %p633_p3 }
  0x12   :  { %643 = shalt.err (!%p640_p7)
}
  0x13   :  { %36 = dma.hbm_to_vmem [thread:$0]  %s935_s1, 128, %s34_s28, [#allocation6]  }
  0x14   :  { %s644_s21 = scalar_lea.hbm %s938_s4, 4096 }
  0x15   :  { %p645_p8 = scmp.ne.s32.totalorder %s938_s4, %s644_s21  ;;  %p648_p9 = scmp.lt.u32.totalorder %s644_s21, %s938_s4 }
  0x17   :  { %p650_p10 = pnand %p648_p9, %p645_p8 }
  0x19   :  { %653 = shalt.err (!%p650_p10)
}
  0x1a   :  { %s654_s26 = scalar_lea.vmem %s820_s30, 4096  ;;  %p659_p12 = scmp.lt.s32.totalorder %s820_s30, %s820_s30 }
  0x1b   :  { %p655_p11 = scmp.ne.s32.totalorder %s820_s30, %s654_s26  ;;  %p660_p13 = scmp.lt.s32.totalorder %s654_s26, %s654_s26 }
  0x1d   :  { %p661_p0 = por %p660_p13, %p659_p12 }
  0x1f   :  { %p662_p1 = pnand %p661_p0, %p655_p11 }
  0x21   :  { %665 = shalt.err (!%p662_p1)
}
  0x22   :  { %s764_s1 = smov 512   ;;  %s765_s27 = smov 32  }
  0x23   :  { %62 = dma.hbm_to_vmem [thread:$0]  %s938_s4, 4096, %s820_s30, [#allocation9], %s764_s1, %s764_s1, %s765_s27  }
  0x24   :  { %s766_s9 = smov [#allocation2]   ;;  %s767_s11 = smov [#allocation7]  }
  0x25   :  { %s23_s10 = sshll.u32 %s766_s9, 4  ;;  %s42_s12 = sshll.u32 %s767_s11, 4  ;;  %s24_s10 = int_to_ptr.vmem [resolvable:$true] %s23_s10  ;;  %s851_s12 = int_to_ptr.vmem [resolvable:$true] %s42_s12 }
  0x26   :  { %s666_s15 = scalar_lea.hbm %s934_s0, 128 }
  0x27   :  { %p667_p2 = scmp.ne.s32.totalorder %s934_s0, %s666_s15  ;;  %p670_p3 = scmp.lt.u32.totalorder %s666_s15, %s934_s0 }
  0x29   :  { %p672_p4 = pnand %p670_p3, %p667_p2 }
  0x2b   :  { %675 = shalt.err (!%p672_p4)
}
  0x2c   :  { %s676_s4 = scalar_lea.vmem %s24_s10, 128  ;;  %p681_p6 = scmp.lt.s32.totalorder %s24_s10, %s24_s10 }
  0x2d   :  { %p677_p5 = scmp.ne.s32.totalorder %s24_s10, %s676_s4  ;;  %p682_p7 = scmp.lt.s32.totalorder %s676_s4, %s676_s4 }
  0x2f   :  { %p683_p8 = por %p682_p7, %p681_p6 }
  0x31   :  { %p684_p9 = pnand %p683_p8, %p677_p5 }
  0x33   :  { %687 = shalt.err (!%p684_p9)
}
  0x34   :  { %26 = dma.hbm_to_vmem [thread:$0]  %s934_s0, 128, %s24_s10, [#allocation3]  }
  0x35   :  { %s688_s23 = scalar_lea.hbm %s936_s2, 256 }
  0x36   :  { %p689_p10 = scmp.ne.s32.totalorder %s936_s2, %s688_s23  ;;  %p692_p11 = scmp.lt.u32.totalorder %s688_s23, %s936_s2 }
  0x38   :  { %p694_p12 = pnand %p692_p11, %p689_p10 }
  0x3a   :  { %697 = shalt.err (!%p694_p12)
}
  0x3b   :  { %s698_s27 = scalar_lea.vmem %s851_s12, 256  ;;  %p703_p0 = scmp.lt.s32.totalorder %s851_s12, %s851_s12 }
  0x3c   :  { %p699_p13 = scmp.ne.s32.totalorder %s851_s12, %s698_s27  ;;  %p704_p1 = scmp.lt.s32.totalorder %s698_s27, %s698_s27 }
  0x3e   :  { %p705_p2 = por %p704_p1, %p703_p0 }
  0x40   :  { %p706_p3 = pnand %p705_p2, %p699_p13 }
  0x42   :  { %709 = shalt.err (!%p706_p3)
}
  0x43   :  { %s768_s0 = smov 128   ;;  %s769_s28 = smov 8  }
  0x44   :  { %48 = dma.hbm_to_vmem [thread:$0]  %s936_s2, 256, %s851_s12, [#allocation6], %s768_s0, %s768_s0, %s769_s28  }
  0x45   :  { %s770_s10 = smov [#allocation10]   ;;  %s710_s15 = scalar_lea.hbm %s940_s6, 1024 }
  0x46   :  { %s70_s11 = sshll.u32 %s770_s10, 4  ;;  %p711_p4 = scmp.ne.s32.totalorder %s940_s6, %s710_s15  ;;  %s71_s11 = int_to_ptr.vmem [resolvable:$true] %s70_s11 }
  0x47   :  { %p714_p5 = scmp.lt.u32.totalorder %s710_s15, %s940_s6 }
  0x49   :  { %p716_p6 = pnand %p714_p5, %p711_p4 }
  0x4b   :  { %719 = shalt.err (!%p716_p6)
}
  0x4c   :  { %s720_s4 = scalar_lea.vmem %s71_s11, 1024  ;;  %p725_p8 = scmp.lt.s32.totalorder %s71_s11, %s71_s11 }
  0x4d   :  { %p721_p7 = scmp.ne.s32.totalorder %s71_s11, %s720_s4  ;;  %p726_p9 = scmp.lt.s32.totalorder %s720_s4, %s720_s4 }
  0x4f   :  { %p727_p10 = por %p726_p9, %p725_p8 }
  0x51   :  { %p728_p11 = pnand %p727_p10, %p721_p7 }
  0x53   :  { %731 = shalt.err (!%p728_p11)
}
  0x54   :  { %76 = dma.hbm_to_vmem [thread:$0]  %s940_s6, 1024, %s71_s11, [#allocation9], %s768_s0, %s768_s0, %s769_s28  }
  0x55   :  { %754 = dma.done.wait [#allocation3], 128  }
  0x56   :  { %755 = vsyncadd [#allocation3], 4294967168 }
  0x57   :  { %756 = dma.done.wait [#allocation6], 384  }
  0x58   :  { %757 = vsyncadd [#allocation6], 4294966912 }
  0x59   :  { %758 = dma.done.wait [#allocation9], 5120  }
  0x5a   :  { %759 = vsyncadd [#allocation9], 4294962176  ;;  %v771_v0 = vmov 0.0|0.0   ;;  %vm772_vm0 = vmmov 0   ;;  %v773_v1 = vmov 0.0   ;;  %v94_v2 = vld [vmem:[#allocation7] sm:$0xff] }
  0x5b   :  { %552 = vmatprep.subr.bf16.mxu0 %v771_v0  ;;  %530 = vmatprep.mubr.msk.f32.mxu0 %vm772_vm0, %v773_v1  ;;  %v95_v3 = vld [vmem:[#allocation7 + $0x8] sm:$0xff]  ;;  %v173_v5 = vld [vmem:[#allocation2] sm:$0xff]  ;;  %v97_v6 = vld [vmem:[#allocation8 + $0x8] sm:$0xff]  ;;  %vm174_vm1 = vcmask 130048   ;;  %vm250_vm2 = vcmask 523264   ;;  %s774_s22 = smov [#allocation11]  }
  0x5c   :  { %318 = vmatprep.mubr.f32.mxu1 %v773_v1  ;;  %v553_v4 = vpack.c.bf16 %v95_v3, %v94_v2  ;;  %v101_v7 = vld [vmem:[#allocation8 + $0x28] sm:$0xff]  ;;  %v99_v8 = vld [vmem:[#allocation8 + $0x18] sm:$0xff]  ;;  %v96_v11 = vld [vmem:[#allocation8] sm:$0xff]  ;;  %s495_s23 = sshll.u32 %s774_s22, 4  ;;  %s496_s23 = int_to_ptr.vmem [resolvable:$true] %s495_s23 }
  0x5d   :  { %v555_v9 = vpack.c.bf16 %v101_v7, %v97_v6  ;;  %v103_v10 = vld [vmem:[#allocation8 + $0x38] sm:$0xff]  ;;  %v100_v12 = vld [vmem:[#allocation8 + $0x20] sm:$0xff]  ;;  %v98_v15 = vld [vmem:[#allocation8 + $0x10] sm:$0xff]  ;;  %s732_s24 = scalar_lea.vmem %s496_s23, 128  ;;  %p737_p13 = scmp.lt.s32.totalorder %s496_s23, %s496_s23 }
  0x5e   :  { %554 = vmatpush3.bf16.msra.mxu0 %v553_v4  ;;  %v571_v13 = vpack.c.bf16 %v103_v10, %v99_v8  ;;  %v557_v14 = vpack.c.bf16 %v100_v12, %v96_v11  ;;  %v102_v16 = vld [vmem:[#allocation8 + $0x30] sm:$0xff]  ;;  %v105_v17 = vld [vmem:[#allocation8 + $0x48] sm:$0xff]  ;;  %v107_v20 = vld [vmem:[#allocation8 + $0x58] sm:$0xff]  ;;  %p733_p12 = scmp.ne.s32.totalorder %s496_s23, %s732_s24  ;;  %p738_p0 = scmp.lt.s32.totalorder %s732_s24, %s732_s24 }
  0x5f   :  { %556 = vmatprep.subr.bf16.mxu1 %v555_v9  ;;  %v573_v18 = vpack.c.bf16 %v102_v16, %v98_v15  ;;  %v109_v19 = vld [vmem:[#allocation8 + $0x68] sm:$0xff]  ;;  %v111_v21 = vld [vmem:[#allocation8 + $0x78] sm:$0xff]  ;;  %v104_v24 = vld [vmem:[#allocation8 + $0x40] sm:$0xff] }
  0x60   :  { %572 = vmatprep.subr.bf16.mxu0 %v571_v13  ;;  %558 = vmatpush1.bf16.msra.mxu1 %v557_v14  ;;  %v559_v22 = vpack.c.bf16 %v109_v19, %v105_v17  ;;  %v575_v23 = vpack.c.bf16 %v111_v21, %v107_v20  ;;  %v108_v25 = vld [vmem:[#allocation8 + $0x60] sm:$0xff]  ;;  %v106_v26 = vld [vmem:[#allocation8 + $0x50] sm:$0xff]  ;;  %v113_v29 = vld [vmem:[#allocation8 + $0x88] sm:$0xff]  ;;  %p739_p1 = por %p738_p0, %p737_p13 }
  0x61   :  { %531 = vmatmul.mubr.msk.f32.vlgmr.msra.gmra.mrb[0].mxu0 %vm174_vm1, %v173_v5  ;;  %v561_v27 = vpack.c.bf16 %v108_v25, %v104_v24  ;;  %v110_v28 = vld [vmem:[#allocation8 + $0x70] sm:$0xff]  ;;  %v117_v30 = vld [vmem:[#allocation8 + $0xa8] sm:$0xff]  ;;  %v115_v33 = vld [vmem:[#allocation8 + $0x98] sm:$0xff] }
  0x62   :  { %574 = vmatpush1.bf16.msra.mxu0 %v573_v18  ;;  %560 = vmatprep.subr.bf16.mxu1 %v559_v22  ;;  %v577_v31 = vpack.c.bf16 %v110_v28, %v106_v26  ;;  %v563_v32 = vpack.c.bf16 %v117_v30, %v113_v29  ;;  %v119_v34 = vld [vmem:[#allocation8 + $0xb8] sm:$0xff]  ;;  %v112_v36 = vld [vmem:[#allocation8 + $0x80] sm:$0xff]  ;;  %v114_v38 = vld [vmem:[#allocation8 + $0x90] sm:$0xff]  ;;  %p740_p2 = pnand %p739_p1, %p733_p12 }
  0x63   :  { %576 = vmatprep.subr.bf16.mxu0 %v575_v23  ;;  %v579_v35 = vpack.c.bf16 %v119_v34, %v115_v33  ;;  %389 = vmatprep.mubr.f32.mxu0 %v773_v1  ;;  %v116_v37 = vld [vmem:[#allocation8 + $0xa0] sm:$0xff]  ;;  %v118_v40 = vld [vmem:[#allocation8 + $0xb0] sm:$0xff]  ;;  %v121_v42 = vld [vmem:[#allocation8 + $0xc8] sm:$0xff] }
  0x64   :  { %562 = vmatpush1.bf16.msra.mxu1 %v561_v27  ;;  %v565_v39 = vpack.c.bf16 %v116_v37, %v112_v36  ;;  %v581_v41 = vpack.c.bf16 %v118_v40, %v114_v38  ;;  %v125_v43 = vld [vmem:[#allocation8 + $0xe8] sm:$0xff]  ;;  %v123_v44 = vld [vmem:[#allocation8 + $0xd8] sm:$0xff]  ;;  %v120_v47 = vld [vmem:[#allocation8 + $0xc0] sm:$0xff] }
  0x65   :  { %564 = vmatprep.subr.bf16.mxu1 %v563_v32  ;;  %v567_v45 = vpack.c.bf16 %v125_v43, %v121_v42  ;;  %v127_v46 = vld [vmem:[#allocation8 + $0xf8] sm:$0xff]  ;;  %v124_v48 = vld [vmem:[#allocation8 + $0xe0] sm:$0xff]  ;;  %v122_v51 = vld [vmem:[#allocation8 + $0xd0] sm:$0xff] }
  0x66   :  { %578 = vmatpush1.bf16.msra.mxu0 %v577_v31  ;;  %v583_v49 = vpack.c.bf16 %v127_v46, %v123_v44  ;;  %v569_v50 = vpack.c.bf16 %v124_v48, %v120_v47  ;;  %v126_v52 = vld [vmem:[#allocation8 + $0xf0] sm:$0xff]  ;;  %v506_v54 = vld [vmem:[%s937_s3] ss:$0 sm:$0xff]  ;;  %v904_v58 = vld [vmem:[#allocation5] sm:$0xff] }
  0x67   :  { %580 = vmatprep.subr.bf16.mxu0 %v579_v35  ;;  %v585_v53 = vpack.c.bf16 %v126_v52, %v122_v51  ;;  %v128_v61 = vld [vmem:[#allocation10] sm:$0xff]  ;;  %v129_v62 = vld [vmem:[#allocation10 + $0x8] sm:$0xff]  ;;  %v130_v2 = vld [vmem:[#allocation10 + $0x10] sm:$0xff] }
  0x68   :  { %566 = vmatpush1.bf16.msra.mxu1 %v565_v39  ;;  %v588_v63 = vpack.c.bf16 %v129_v62, %v128_v61  ;;  %v131_v3 = vld [vmem:[#allocation10 + $0x18] sm:$0xff]  ;;  %v132_v5 = vld [vmem:[#allocation10 + $0x20] sm:$0xff]  ;;  %v133_v6 = vld [vmem:[#allocation10 + $0x28] sm:$0xff] }
  0x69   :  { %568 = vmatprep.subr.bf16.mxu1 %v567_v45  ;;  %v591_v4 = vpack.c.bf16 %v131_v3, %v130_v2  ;;  %v594_v7 = vpack.c.bf16 %v133_v6, %v132_v5  ;;  %v134_v8 = vld [vmem:[#allocation10 + $0x30] sm:$0xff]  ;;  %v135_v9 = vld [vmem:[#allocation10 + $0x38] sm:$0xff]  ;;  %v143_v13 = vld [vmem:[%s939_s5] sm:$0xf] }
  0x6a   :  { %582 = vmatpush1.bf16.msra.mxu0 %v581_v41  ;;  %v597_v10 = vpack.c.bf16 %v135_v9, %v134_v8  ;;  %v507_v43 = vld [vmem:[%s941_s7] ss:$0 sm:$0xff] }
  0x6b   :  { %584 = vmatprep.subr.bf16.mxu0 %v583_v49 }
  0x6c   :  { %570 = vmatpush1.bf16.msra.mxu1 %v569_v50 }
  0x6d   :  { %587 = vmatprep.subr.bf16.mxu1 %v771_v0 }
  0x6e   :  { %586 = vmatpush1.bf16.msra.mxu0 %v585_v53 }
 0x134   :  { %v244_v55 = vpop.f32.mrb[0].mxu0 }
 0x135   :  { %v245_v56 = vadd.f32 %v506_v54, %v244_v55  ;;  %v532_v57 = vpop.f32.mrb[1].mxu0 }
 0x137   :  { %v248_v59 = vmax.f32 %v245_v56, 0.0 }
 0x139   :  { %v249_v60 = vadd.f32 %v248_v59, %v904_v58 }
 0x13b   :  { %509 = vmatmul.mubr.msk.f32.vlgmr.msra.gmra.mrb[0].mxu1 %vm250_vm2, %v249_v60  ;;  %510 = vmatmul.mubr.msk.f32.vlgmr.msra.gmra.mrb[2].mxu0 %vm250_vm2, %v249_v60 }
 0x13c   :  { %549 = vmatprep.mubr.msk.f32.mxu1 %vm772_vm0, %v773_v1  ;;  %589 = vmatpush3.bf16.msra.mxu1 %v588_v63  ;;  %v145_v1 = vlaneseq }
 0x13d   :  { %590 = vmatprep.subr.bf16.mxu1 %v771_v0 }
 0x13e   :  { %v146_v11 = vshrl.u32 %v145_v1, 7 }
 0x140   :  { %592 = vmatpush3.bf16.msra.mxu1 %v591_v4  ;;  %v147_v12 = vsub.s32 0, %v146_v11  ;;  %v151_v14 = vsub.s32 1, %v146_v11  ;;  %v159_v26 = vsub.s32 3, %v146_v11  ;;  %v155_v27 = vsub.s32 2, %v146_v11 }
 0x141   :  { %593 = vmatprep.subr.bf16.mxu1 %v771_v0 }
 0x142   :  { %v148_v15 = vrot.slane %v143_v13, %v147_v12  ;;  %v152_v18 = vrot.slane %v143_v13, %v151_v14  ;;  %v160_v29 = vrot.slane %v143_v13, %v159_v26  ;;  %v156_v30 = vrot.slane %v143_v13, %v155_v27 }
 0x144   :  { %595 = vmatpush3.bf16.msra.mxu1 %v594_v7 }
 0x145   :  { %596 = vmatprep.subr.bf16.mxu1 %v771_v0 }
 0x148   :  { %598 = vmatpush3.bf16.msra.mxu1 %v597_v10 }
 0x20e   :  { %v320_v16 = vpop.f32.mrb[0].mxu1  ;;  %v391_v17 = vpop.f32.mrb[2].mxu0 }
 0x20f   :  { %v321_v19 = vadd.f32 %v320_v16, %v148_v15  ;;  %v322_v20 = vpop.f32.mrb[1].mxu1  ;;  %v393_v21 = vpop.f32.mrb[3].mxu0  ;;  %v392_v34 = vadd.f32 %v391_v17, %v156_v30 }
 0x210   :  { %v323_v23 = vadd.f32 %v322_v20, %v152_v18  ;;  %v394_v32 = vadd.f32 %v393_v21, %v160_v29 }
 0x211   :  { %v511_v22 = vmul.f32 -1.442695, %v321_v19 }
 0x212   :  { %v512_v0 = vmul.f32 -1.442695, %v323_v23 }
 0x213   :  { %612 = vpow2.f32 %v511_v22 }
 0x214   :  { %614 = vpow2.f32 %v512_v0 }
 0x21d   :  { %v613_v24 = vpop.eup %612 }
 0x21e   :  { %v399_v25 = vadd.f32 1.0, %v613_v24  ;;  %v615_v28 = vpop.eup %614 }
 0x21f   :  { %v405_v31 = vadd.f32 1.0, %v615_v28 }
 0x220   :  { %616 = vrcp.f32 %v399_v25 }
 0x221   :  { %618 = vrcp.f32 %v405_v31 }
 0x22a   :  { %v617_v33 = vpop.eup %616 }
 0x22b   :  { %v408_v35 = vmul.f32 %v617_v33, %v394_v32  ;;  %v619_v37 = vpop.eup %618 }
 0x22c   :  { %v411_v38 = vsub.f32 1.0, %v619_v37  ;;  %v413_v41 = vmul.f32 %v619_v37, %v904_v58 }
 0x22d   :  { %v409_v36 = vadd.f32 %v408_v35, %v392_v34 }
 0x22f   :  { %620 = vtanh.f32 %v409_v36 }
 0x239   :  { %v621_v39 = vpop.eup %620 }
 0x23a   :  { %v412_v40 = vmul.f32 %v621_v39, %v411_v38 }
 0x23c   :  { %v414_v42 = vadd.f32 %v413_v41, %v412_v40 }
 0x23e   :  { %550 = vmatmul.mubr.msk.f32.vlgmr.msra.gmra.mrb[2].mxu1 %vm250_vm2, %v414_v42 }
 0x311   :  { %v484_v44 = vpop.f32.mrb[2].mxu1 }
 0x312   :  { %v485_v45 = vadd.f32 %v507_v43, %v484_v44  ;;  %v551_v46 = vpop.f32.mrb[3].mxu1 }
 0x314   :  { %488 = vst [vmem:[#allocation11] sm:$0xff] %v485_v45 }
 0x315   :  { %743 = shalt.err (!%p740_p2)
}
 0x316   :  { %s744_s1 = scalar_lea.hbm %s942_s8, 128 }
 0x317   :  { %p745_p3 = scmp.ne.s32.totalorder %s942_s8, %s744_s1  ;;  %p748_p4 = scmp.lt.u32.totalorder %s744_s1, %s942_s8 }
 0x319   :  { %p750_p5 = pnand %p748_p4, %p745_p3 }
 0x31b   :  { %753 = shalt.err (!%p750_p5)
}
 0x31c   :  { %498 = dma.vmem_to_hbm [thread:$0]  %s496_s23, 128, %s942_s8, [#allocation4]  }
 0x31d   :  { %760 = dma.done.wait [#allocation4], 128  }
 0x31e   :  { %761 = vsyncadd [#allocation4], 4294967168 }
 0x31f   :  { %502 = vsyncpa [#allocation3], 1 }
 0x320   :  { %503 = vsyncpa [#allocation6], 1 }
 0x321   :  { %504 = vsyncpa [#allocation9], 1 }
 0x322   :  { %505 = vsyncpa [#allocation4], 1 }

</bundles_post_ra>
